<compile_context>
chip_gen: v7x
topology: tpu7x:2x2x1
jax: 0.10.0
libtpu: 0.0.40
codegen_flags: <defaults>
</compile_context>

<pallas_src>
import functools

import jax
import jax.numpy as jnp
from jax.experimental import pallas as pl
from jax.experimental.pallas import tpu as pltpu


def _round_up(a, m):
    return ((a + m - 1) // m) * m


def _spec_conv_kernel(theta_ref, x_ref, lam_ref, w_ref, e_ref, b_ref, o_ref,
                      *, K, p, compute_dtype):
    # Per-row spectral scale via Horner's rule; theta[k] are SMEM scalars.
    lam = lam_ref[...]                                    # (tile_np, p) f32
    scale = jnp.full_like(lam, theta_ref[K - 1])
    for k in range(K - 2, -1, -1):
        scale = scale * lam + theta_ref[k]

    # x arrives in its native dtype; cast to the MXU operand dtype in-register
    # (keeps the HBM x stream at native width, no wrapper-side cast pass).
    xq = x_ref[...].astype(compute_dtype)
    y = jnp.dot(xq, w_ref[...], preferred_element_type=jnp.float32)   # (tile_np, Op)

    # Expand the per-(row, group) scale across the p packed groups with a small
    # MXU matmul against an exact 0/1 matrix.  Kept in f32 for precision; the
    # MXU is nowhere near the binding unit in this memory-bound kernel.
    if p > 1:
        scale = jnp.dot(scale, e_ref[...], preferred_element_type=jnp.float32)
    # p == 1: scale is (tile_np, 1) and broadcasts over the O lanes.

    o_ref[...] = (y * scale + b_ref[...]).astype(o_ref.dtype)


def _pack_factor(D, O, lanes):
    """Smallest p with p*D and p*O both multiples of `lanes`."""
    for p in range(1, 2 * lanes + 1):
        if (p * D) % lanes == 0 and (p * O) % lanes == 0:
            return p
    return 1


def _hw_plan():
    """Generation-aware VMEM budget, per-step HBM byte target, core count."""
    kind = ""
    try:
        kind = jax.devices()[0].device_kind.lower()
    except Exception:
        pass
    vmem_phys = None
    try:  # best effort; guarded in case the attribute differs across versions
        vmem_phys = int(pltpu.get_tpu_info().vmem_capacity_bytes)
    except Exception:
        pass
    if "v7" in kind:
        phys = vmem_phys or (64 << 20)           # 64 MiB per TensorCore
        return dict(budget=min(40 << 20, (phys * 5) // 8),
                    limit_cap=max(32 << 20, phys - (8 << 20)),
                    step_bytes=16 << 20, cores=2, wide_lanes=True)
    if "v6" in kind:
        phys = vmem_phys or (128 << 20)
        return dict(budget=min(56 << 20, phys // 2),
                    limit_cap=min(100 << 20, phys - (16 << 20)),
                    step_bytes=8 << 20, cores=1, wide_lanes=True)
    # v5e / unknown: conservative budget, explicit limit above the 16 MiB
    # scoped default.
    phys = vmem_phys or (128 << 20)
    return dict(budget=min(40 << 20, phys // 3),
                limit_cap=min(80 << 20, max(32 << 20, phys - (16 << 20))),
                step_bytes=6 << 20, cores=1, wide_lanes=False)


def spec_conv(x, lam, theta, weight, bias, *, tile_rows=None,
              compute_dtype=jnp.bfloat16, out_dtype=jnp.float32):
    """x: (N, D), lam: (N,), theta: (K,), weight: (O, D), bias: (O,) -> (N, O).

    compute_dtype: MXU operand dtype; x is cast IN-KERNEL so the HBM x stream
      stays in x.dtype.  Pass jnp.float32 for f32-faithful parity with PyTorch.
    out_dtype: output HBM stream dtype (bf16 cuts total HBM traffic ~1/3 when
      the consumer tolerates it).  Default f32 preserves module semantics.
    tile_rows: optional override of (un-packed) rows per grid step; by default
      the tile is derived from a generation-aware per-step byte target and a
      VMEM working-set budget.
    """
    N, D = x.shape
    O, D_w = weight.shape
    assert D_w == D
    K = int(theta.shape[0])

    plan = _hw_plan()

    # Lane packing factor: p rows per full-lane vector row.
    p = _pack_factor(D, O, 128)
    if plan["wide_lanes"]:
        p256 = _pack_factor(D, O, 256)           # 256-wide MXU on v6e/v7x
        if p256 * max(D, O) <= 2048:             # keep block-diag W modest
            p = p256

    # Pad N to a multiple of p with zero rows (never fall back to p=1, which
    # would make the output store a masked partial write).  Pad rows sliced off.
    pad = (-N) % p
    if pad:
        x = jnp.pad(x, ((0, pad), (0, 0)))
        lam = jnp.pad(lam, ((0, pad),))
    Npad = N + pad
    Np, Dp, Op = Npad // p, p * D, p * O

    # Packed views / parameters.  x stays in its native dtype (cast in-kernel).
    x_p = x.reshape(Np, Dp)
    lam_p = lam.reshape(Np, p).astype(jnp.float32)
    w_p = jnp.kron(jnp.eye(p, dtype=jnp.float32),
                   weight.T.astype(jnp.float32)).astype(compute_dtype)   # (Dp, Op)
    e_p = jnp.kron(jnp.eye(p, dtype=jnp.float32),
                   jnp.ones((1, O), jnp.float32))                        # (p, Op)
    b_p = jnp.tile(bias.reshape(1, O).astype(jnp.float32), (1, p))       # (1, Op)
    theta_f = theta.astype(jnp.float32)

    # ---- Budget-driven tile sizing -----------------------------------------
    xb = jnp.dtype(x.dtype).itemsize
    cb = jnp.dtype(compute_dtype).itemsize
    ob = jnp.dtype(out_dtype).itemsize
    hbm_per_row = Dp * xb + p * 4 + Op * ob           # x + lam + out per packed row
    per_row = 2 * hbm_per_row + Dp * cb + Op * 4      # dbl-buffered DMA + xq/y temps
    fixed = 2 * (Dp * Op * cb + p * Op * 4 + Op * 4)  # W, E, bias (dbl-buffered)
    # NOTE: for very large D/O, W/E/bias could be single-buffered
    # (pipeline_mode=pl.Buffered(1)) or Op split; negligible at SpecConv sizes.

    avail = plan["budget"] - fixed
    if avail < per_row * 8:          # guard against degenerate/negative budgets
        avail = per_row * 8
    max_np = max(8, (avail // per_row) // 8 * 8)

    if tile_rows is None:
        target = max(8, plan["step_bytes"] // hbm_per_row)   # >= ~6-16 MB/step
    else:
        target = max(tile_rows // p, 1)
    tile_np = min(max_np, _round_up(target, 8), _round_up(Np, 8))

    # On multi-TensorCore parts (v7x) split into at least one step per core.
    if plan["cores"] > 1 and Np > 8 * plan["cores"]:
        tile_np = min(tile_np, _round_up(pl.cdiv(Np, plan["cores"]), 8))

    grid = (pl.cdiv(Np, tile_np),)

    vmem_limit = fixed + per_row * tile_np + (4 << 20)
    vmem_limit = int(min(max(vmem_limit, 32 << 20), plan["limit_cap"]))

    kernel = functools.partial(_spec_conv_kernel, K=K, p=p,
                               compute_dtype=compute_dtype)

    out_p = pl.pallas_call(
        kernel,
        out_shape=jax.ShapeDtypeStruct((Np, Op), out_dtype),
        grid_spec=pltpu.PrefetchScalarGridSpec(
            num_scalar_prefetch=1,                   # theta -> SMEM scalars
            grid=grid,
            in_specs=[
                pl.BlockSpec((tile_np, Dp), lambda i, th: (i, 0)),   # packed x tile
                pl.BlockSpec((tile_np, p), lambda i, th: (i, 0)),    # packed Lambda
                pl.BlockSpec((Dp, Op), lambda i, th: (0, 0)),        # block-diag W^T
                pl.BlockSpec((p, Op), lambda i, th: (0, 0)),         # scale expander
                pl.BlockSpec((1, Op), lambda i, th: (0, 0)),         # packed bias
            ],
            out_specs=pl.BlockSpec((tile_np, Op), lambda i, th: (i, 0)),
        ),
        compiler_params=pltpu.CompilerParams(
            dimension_semantics=("parallel",),
            vmem_limit_bytes=vmem_limit),
    )(theta_f, x_p, lam_p, w_p, e_p, b_p)

    out = out_p.reshape(Npad, O)
    return out[:N] if pad else out


def spec_conv_reference(x, lam, theta, weight, bias, compute_dtype=jnp.float32):
    """Pure-JAX reference in the original (pre-scale, power-form) semantics;
    compute_dtype mimics the kernel's matmul-operand quantisation."""
    xq = x.astype(compute_dtype).astype(jnp.float32)
    wq = weight.astype(compute_dtype).astype(jnp.float32)
    lam2 = lam.reshape(-1, 1).astype(jnp.float32)
    out = theta[0] * xq
    for k in range(1, theta.shape[0]):
        out = out + theta[k] * (lam2 ** k) * xq
    return out @ wq.T + bias.astype(jnp.float32)


if __name__ == "__main__":
    # Small shapes consistent with the module: N = batch * num_nodes.
    batch, num_nodes = 2, 101
    N = batch * num_nodes            # 202 -> exercises row padding + partial tiles
    input_size = 32
    out_size = 32
    K = 3

    key = jax.random.PRNGKey(0)
    kx, kl, kw, kb = jax.random.split(key, 4)

    x = jax.random.normal(kx, (N, input_size), dtype=jnp.float32)
    lam = jax.random.uniform(kl, (N,), dtype=jnp.float32, minval=0.0, maxval=2.0)

    # theta = ones (as in reset_parameters); Linear params ~ U(-1/sqrt(in), +).
    theta = jnp.ones((K,), dtype=jnp.float32)
    bound = 1.0 / (input_size ** 0.5)
    weight = jax.random.uniform(kw, (out_size, input_size), dtype=jnp.float32,
                                minval=-bound, maxval=bound)
    bias = jax.random.uniform(kb, (out_size,), dtype=jnp.float32,
                              minval=-bound, maxval=bound)

    ref_f32 = spec_conv_reference(x, lam, theta, weight, bias)

    # 1) Exact-f32 operand path, small tile -> multi-step grid + padding path.
    out_f32 = spec_conv(x, lam, theta, weight, bias,
                        tile_rows=128, compute_dtype=jnp.float32)
    out_f32 = jax.block_until_ready(out_f32)
    assert out_f32.shape == (N, out_size)
    assert jnp.allclose(out_f32, ref_f32, atol=1e-3, rtol=1e-3)

    # 2) Default path: budget-driven tiles, bf16 matmul operands, f32 output.
    out_def = spec_conv(x, lam, theta, weight, bias)
    out_def = jax.block_until_ready(out_def)
    ref_bf16 = spec_conv_reference(x, lam, theta, weight, bias,
                                   compute_dtype=jnp.bfloat16)
    assert out_def.shape == (N, out_size)
    assert jnp.allclose(out_def, ref_bf16, atol=2e-3, rtol=2e-3)
    assert jnp.allclose(out_def, ref_f32, atol=0.5, rtol=0.5)

    # 3) Optional bf16 output stream (for consumers that tolerate it).
    out_b16 = spec_conv(x, lam, theta, weight, bias, out_dtype=jnp.bfloat16)
    out_b16 = jax.block_until_ready(out_b16)
    assert out_b16.dtype == jnp.bfloat16
    assert jnp.allclose(out_b16.astype(jnp.float32), ref_bf16,
                        atol=6e-2, rtol=3e-2)

    print("KERNEL_OK")
</pallas_src>

<mosaic_0001>
module attributes {stable_mosaic.version = 11 : i64} {
  func.func @_spec_conv_kernel(%arg0: i32, %arg1: memref<3xf32, #tpu.memory_space<smem>>, %arg2: memref<32x128xf32, #tpu.memory_space<vmem>>, %arg3: memref<32x4xf32, #tpu.memory_space<vmem>>, %arg4: memref<128x128xf32, #tpu.memory_space<vmem>>, %arg5: memref<4x128xf32, #tpu.memory_space<vmem>>, %arg6: memref<1x128xf32, #tpu.memory_space<vmem>>, %arg7: memref<32x128xf32, #tpu.memory_space<vmem>>) attributes {dimension_semantics = [#tpu.dimension_semantics<parallel>], iteration_bounds = array<i64: 2>, scalar_prefetch = 1 : i64, scratch_operands = 0 : i64, tpu.core_type = #tpu.core_type<tc>, window_params = [{transform_indices = @transform_0, window_bounds = array<i64: 32, 128>}, {transform_indices = @transform_1, window_bounds = array<i64: 32, 4>}, {pipeline_mode = #tpu.pipeline_mode<synchronous>, transform_indices = @transform_2, window_bounds = array<i64: 128, 128>}, {pipeline_mode = #tpu.pipeline_mode<synchronous>, transform_indices = @transform_3, window_bounds = array<i64: 4, 128>}, {pipeline_mode = #tpu.pipeline_mode<synchronous>, transform_indices = @transform_4, window_bounds = array<i64: 1, 128>}, {transform_indices = @transform_5, window_bounds = array<i64: 32, 128>}]} {
    %c0 = arith.constant 0 : index
    %c0_0 = arith.constant 0 : index
    %0 = vector.load %arg3[%c0, %c0_0] : memref<32x4xf32, #tpu.memory_space<vmem>>, vector<32x4xf32>
    %c2 = arith.constant 2 : index
    %1 = memref.load %arg1[%c2] : memref<3xf32, #tpu.memory_space<smem>>
    %2 = vector.broadcast %1 : f32 to vector<32x4xf32>
    %3 = arith.mulf %2, %0 : vector<32x4xf32>
    %c1 = arith.constant 1 : index
    %4 = memref.load %arg1[%c1] : memref<3xf32, #tpu.memory_space<smem>>
    %5 = vector.broadcast %4 : f32 to vector<32x4xf32>
    %6 = arith.addf %3, %5 : vector<32x4xf32>
    %7 = arith.mulf %6, %0 : vector<32x4xf32>
    %c0_1 = arith.constant 0 : index
    %8 = memref.load %arg1[%c0_1] : memref<3xf32, #tpu.memory_space<smem>>
    %9 = vector.broadcast %8 : f32 to vector<32x4xf32>
    %10 = arith.addf %7, %9 : vector<32x4xf32>
    %c0_2 = arith.constant 0 : index
    %c0_3 = arith.constant 0 : index
    %11 = vector.load %arg2[%c0_2, %c0_3] : memref<32x128xf32, #tpu.memory_space<vmem>>, vector<32x128xf32>
    %c0_4 = arith.constant 0 : index
    %c0_5 = arith.constant 0 : index
    %12 = vector.load %arg4[%c0_4, %c0_5] : memref<128x128xf32, #tpu.memory_space<vmem>>, vector<128x128xf32>
    %cst = arith.constant dense<0.000000e+00> : vector<32x128xf32>
    %13 = tpu.matmul %11, %12, %cst {dimension_numbers = #tpu.dot_dimension_numbers<[1], [0], [0], [1], [0, 0, 1, 1], [], []>} : vector<32x128xf32>, vector<128x128xf32>, vector<32x128xf32> -> vector<32x128xf32>
    %c0_6 = arith.constant 0 : index
    %c0_7 = arith.constant 0 : index
    %14 = vector.load %arg5[%c0_6, %c0_7] : memref<4x128xf32, #tpu.memory_space<vmem>>, vector<4x128xf32>
    %cst_8 = arith.constant dense<0.000000e+00> : vector<32x128xf32>
    %15 = tpu.matmul %10, %14, %cst_8 {dimension_numbers = #tpu.dot_dimension_numbers<[1], [0], [0], [1], [0, 0, 1, 1], [], []>} : vector<32x4xf32>, vector<4x128xf32>, vector<32x128xf32> -> vector<32x128xf32>
    %16 = arith.mulf %13, %15 : vector<32x128xf32>
    %c0_9 = arith.constant 0 : index
    %c0_10 = arith.constant 0 : index
    %17 = vector.load %arg6[%c0_9, %c0_10] : memref<1x128xf32, #tpu.memory_space<vmem>>, vector<1x128xf32>
    %18 = vector.broadcast %17 : vector<1x128xf32> to vector<32x128xf32>
    %19 = arith.addf %16, %18 : vector<32x128xf32>
    %c0_11 = arith.constant 0 : index
    %c0_12 = arith.constant 0 : index
    %20 = vector.load %arg7[%c0_11, %c0_12] : memref<32x128xf32, #tpu.memory_space<vmem>>, vector<32x128xf32>
    tpu.vector_store %arg7[%c0_11, %c0_12], %19 {strides = array<i32>} : memref<32x128xf32, #tpu.memory_space<vmem>>, vector<32x128xf32>,
    return
  }
  func.func @transform_0(%arg0: i32, %arg1: memref<3xf32, #tpu.memory_space<smem>>) -> (i32, i32) {
    %c0_i32 = arith.constant 0 : i32
    %c0_i32_0 = arith.constant 0 : i32
    return %arg0, %c0_i32 : i32, i32
  }
  func.func @transform_1(%arg0: i32, %arg1: memref<3xf32, #tpu.memory_space<smem>>) -> (i32, i32) {
    %c0_i32 = arith.constant 0 : i32
    %c0_i32_0 = arith.constant 0 : i32
    return %arg0, %c0_i32 : i32, i32
  }
  func.func @transform_2(%arg0: i32, %arg1: memref<3xf32, #tpu.memory_space<smem>>) -> (i32, i32) {
    %c0_i32 = arith.constant 0 : i32
    %c0_i32_0 = arith.constant 0 : i32
    %c0_i32_1 = arith.constant 0 : i32
    return %c0_i32, %c0_i32_0 : i32, i32
  }
  func.func @transform_3(%arg0: i32, %arg1: memref<3xf32, #tpu.memory_space<smem>>) -> (i32, i32) {
    %c0_i32 = arith.constant 0 : i32
    %c0_i32_0 = arith.constant 0 : i32
    %c0_i32_1 = arith.constant 0 : i32
    return %c0_i32, %c0_i32_0 : i32, i32
  }
  func.func @transform_4(%arg0: i32, %arg1: memref<3xf32, #tpu.memory_space<smem>>) -> (i32, i32) {
    %c0_i32 = arith.constant 0 : i32
    %c0_i32_0 = arith.constant 0 : i32
    %c0_i32_1 = arith.constant 0 : i32
    return %c0_i32, %c0_i32_0 : i32, i32
  }
  func.func @transform_5(%arg0: i32, %arg1: memref<3xf32, #tpu.memory_space<smem>>) -> (i32, i32) {
    %c0_i32 = arith.constant 0 : i32
    %c0_i32_0 = arith.constant 0 : i32
    return %arg0, %c0_i32 : i32, i32
  }
}

</mosaic_0001>

<bundles_post_ra>
// kernel: tpu_custom_call.1
= control target key start
LH: loop header
LB: loop body
LE: loop exit
PB: predicated region body
PF: predicated region fallthrough
CT: control target
= control target key end

     0   :  { %s1188_s0 = inlined_call_operand.vmem [shape: f32[3], index: 0, kind: input, shape index: {}]   ;;  %s1189_s1 = inlined_call_operand.vmem [shape: f32[51,128], index: 1, kind: input, shape index: {}]   ;;  %s1190_s2 = inlined_call_operand.vmem [shape: f32[51,4], index: 2, kind: input, shape index: {}]   ;;  %s1191_s3 = inlined_call_operand.hbm [shape: f32[128,128], index: 3, kind: input, shape index: {}]   ;;  %s1192_s4 = inlined_call_operand.vmem [shape: f32[4,128], index: 4, kind: input, shape index: {}]   ;;  %s1193_s5 = inlined_call_operand.vmem [shape: f32[1,128], index: 5, kind: input, shape index: {}]   ;;  %s1194_s6 = inlined_call_operand.hbm [shape: f32[51,128], index: 6, kind: output, shape index: {}]  }
   0x1   :  { %s11_s23 = sshll.u32 %s1188_s0, 4  ;;  %s12_s23 = int_to_ptr.vmem [resolvable:$true] %s11_s23 }
   0x2   :  { %s859_s24 = scalar_lea.vmem %s12_s23, 16  ;;  %p864_p1 = scmp.lt.s32.totalorder %s12_s23, %s12_s23 }
   0x3   :  { %p860_p0 = scmp.ne.s32.totalorder %s12_s23, %s859_s24  ;;  %p865_p2 = scmp.lt.s32.totalorder %s859_s24, %s859_s24 }
   0x5   :  { %p866_p3 = por %p865_p2, %p864_p1 }
   0x7   :  { %p867_p4 = pnand %p866_p3, %p860_p0 }
   0x9   :  { %870 = shalt.err (!%p867_p4)  }
   0xa   :  { %s969_s25 = smov [#allocation3]  }
   0xb   :  { %14 = dma.vmem_to_smem %s12_s23, 16, %s969_s25, [#allocation2] }
   0xc   :  { %943 = dma.done.wait [#allocation2], 16 }
   0xd   :  { %944 = vsyncadd [#allocation2], 4294967280 }
   0xe   :  { %16 = sfence }
   0xf   :  { %17 = vsyncpa [#allocation5], 0 }
  0x10   :  { %18 = vsyncpa [#allocation6], 0 }
  0x11   :  { %20 = vsyncpa [#allocation6 + $0x1], 0  ;;  %s1014_s26 = smov 0   ;;  %s1016_s27 = smov 0  }
  0x12   :  { %s1018_s0 = smov 0   ;;  %s1020_s28 = smov 0  }
  0x13 LB: > { %s1035_s29 = sadd.s32 4294967295, %s967_s28   ;;  %s673_s30 = sadd.s32 4294967294, %s967_s28   ;;  %s967_s28 = sphi %s1020_s28, %s1209_s28   ;;  %s963_s0 = sphi %s1018_s0, %s1208_s0   ;;  %s959_s27 = sphi %s1016_s27, %s1207_s27   ;;  %s955_s26 = sphi %s1014_s26, %s1206_s26  }
  0x14   : > { %s1039_s7 = sadd.s32 1, %s967_s28   ;;  %s148_s8 = sadd.s32 1, %s963_s0 }
  0x15   : > { %s145_s9 = ssub.s32 %s967_s28, %s1039_s7  ;;  %p158_p5 = scmp.ne.s32.totalorder %s963_s0, %s959_s27 }
  0x16   : > { %p146_p6 = scmp.eq.s32.totalorder %s145_s9, 0  ;;  %p159_p7 = scmp.eq.s32.totalorder %s1035_s29, 1 }
  0x17   : > { %p164_p8 = scmp.ne.s32.totalorder %s959_s27, %s955_s26  ;;  %p165_p9 = scmp.eq.s32.totalorder %s673_s30, 1 }
  0x18   : > { %s1050_s10 = scalar_select %p146_p6, %s963_s0, %s148_s8  }
  0x19   : > { %p1052_p10 = por %p159_p7, %p158_p5  ;;  %p1056_p11 = por %p165_p9, %p164_p8 }
  0x1a   : > { %p674_p12 = scmp.ge.s32.totalorder %s967_s28, 1  ;;  %p172_p13 = scmp.lt.s32.totalorder %s967_s28, 3 }
  0x1b   : > { %s1197_s11 = scalar_select %p1052_p10, 1, 0 }
  0x1c   : > { %s1198_s12 = scalar_select %p1056_p11, 1, 0 }
  0x1d   : > { %p1195_p0 = scmp.eq.s32.totalorder %s1035_s29, 0  ;;  %p1063_p1 = pnand %p674_p12, %p172_p13 }
  0x1e   : > { %s970_s14 = smov [#allocation4]   ;;  %s871_s19 = scalar_lea.hbm %s1191_s3, 2048 }
  0x1f   : > { %s1199_s13 = scalar_select %p1063_p1, 1, 0 }
  0x20   : > { %s184_s15 = sshll.u32 %s970_s14, 4  ;;  %p810_p2 = pneg %p1063_p1  ;;  %s185_s15 = int_to_ptr.vmem [resolvable:$true] %s184_s15 }
  0x21   : > { %p872_p4 = scmp.ne.s32.totalorder %s1191_s3, %s871_s19  ;;  %p878_p8 = scmp.lt.u32.totalorder %s871_s19, %s1191_s3 }
  0x22   : > { %p1071_p3 = pnand %p1195_p0, %p810_p2 }
  0x24   : > { %p873_p5 = pneg %p1071_p3 }
  0x26   : > { %p874_p6 = pnand %p873_p5, %p872_p4 }
  0x28   : > { %p875_p7 = pneg %p874_p6 }
  0x2a   : > { %p880_p9 = pnand %p878_p8, %p875_p7 }
  0x2c   : > { %883 = shalt.err (!%p880_p9)
}
  0x2d   : > { %s884_s24 = scalar_lea.vmem %s185_s15, 2048  ;;  %p892_p0 = scmp.lt.s32.totalorder %s185_s15, %s185_s15 }
  0x2e   : > { %p885_p12 = scmp.ne.s32.totalorder %s185_s15, %s884_s24  ;;  %p893_p11 = scmp.lt.s32.totalorder %s884_s24, %s884_s24 }
  0x30   : > { %p887_p13 = pnand %p885_p12, %p873_p5  ;;  %p894_p10 = por %p893_p11, %p892_p0 }
  0x32   : > { %p888_p2 = pneg %p887_p13 }
  0x34   : > { %p895_p1 = pnand %p894_p10, %p888_p2 }
  0x36   : > { %898 = shalt.err (!%p895_p1)
}
  0x37   : > { %s971_s25 = smov 128   ;;  %s972_s30 = smov 8  }
  0x38   : > { %813 = dma.hbm_to_vmem [thread:$0]  (!%p1071_p3), %s1191_s3, 2048, %s185_s15, [#allocation5], %s971_s25, %s971_s25, %s972_s30  }
  0x39   : > { %p1201_p4 = scmp.ne.s32.totalorder %s1199_s13, 0 }
  0x3a   : > { %p1202_p6 = scmp.eq.s32.totalorder (!%p1201_p4), %s1035_s29, 0 }
  0x3b   : > { %240 = sbr.rel (%p1201_p4) target bundleno = 352 (0x160), region = 40 }
  0x42   : > { %946 = dma.done.wait (%p1202_p6), [#allocation5], 2048   ;;  %p1203_p5 = pmov %p1202_p6 }
  0x43   : > { %s1098_s14 = sshll.u32 %s1035_s29, 2  ;;  %s684_s16 = sld [smem:[#allocation3 + $0x2]]  ;;  %v344_v0 = vld [vmem:[#allocation4] sm:$0xff]  ;;  %v345_v1 = vld [vmem:[#allocation4 + $0x8] sm:$0xff]  ;;  %v346_v2 = vld [vmem:[#allocation4 + $0x10] sm:$0xff]  ;;  %vm459_vm0 = vcmask 1043456  }
  0x44   : > { %948 = vsyncadd (%p1203_p5), [#allocation5], 4294965248  ;;  %p286_p10 = scmp.lt.s32.totalorder %s1098_s14, 6  ;;  %s685_s18 = sld [smem:[#allocation3 + $0x1]]  ;;  %v773_v3 = vpack.c.bf16 %v345_v1, %v344_v0  ;;  %v347_v4 = vld [vmem:[#allocation4 + $0x18] sm:$0xff]  ;;  %v348_v6 = vld [vmem:[#allocation4 + $0x20] sm:$0xff] }
  0x45   : > { %s1102_s13 = sld [smem:[#allocation3]]  ;;  %v777_v5 = vpack.c.bf16 %v347_v4, %v346_v2  ;;  %v349_v7 = vld [vmem:[#allocation4 + $0x28] sm:$0xff]  ;;  %v350_v10 = vld [vmem:[#allocation4 + $0x30] sm:$0xff]  ;;  %v445_v11 = vld [vmem:[%s1192_s4] sm:$0xf]  ;;  %vm446_vm1 = vcmask 31744  }
  0x46   : > { %s287_s17 = scalar_select %p286_p10, %s1098_s14, 6  ;;  %774 = vmatprep.subr.bf16.mxu0 %v773_v3  ;;  %v781_v9 = vpack.c.bf16 %v349_v7, %v348_v6  ;;  %v351_v14 = vld [vmem:[#allocation4 + $0x38] sm:$0xff]  ;;  %765 = vmatprep.subr.msk.mxu1 %vm459_vm0, %v445_v11  ;;  %v352_v27 = vld [vmem:[#allocation4 + $0x40] sm:$0xff]  ;;  %v353_v28 = vld [vmem:[#allocation4 + $0x48] sm:$0xff] }
  0x47   : > { %776 = vmatpush3.bf16.msra.mxu0 %v773_v3  ;;  %766 = vmatpush3.msk.msra.mxu1 %vm459_vm0, %v445_v11  ;;  %v785_v24 = vpack.c.bf16 %v351_v14, %v350_v10  ;;  %v789_v36 = vpack.c.bf16 %v353_v28, %v352_v27  ;;  %v354_v38 = vld [vmem:[#allocation4 + $0x50] sm:$0xff]  ;;  %v355_v39 = vld [vmem:[#allocation4 + $0x58] sm:$0xff]  ;;  %v356_v43 = vld [vmem:[#allocation4 + $0x60] sm:$0xff]  ;;  %s278_s8 = sand.u32 1, %s959_s27   ;;  %p1204_p11 = scmp.ne.s32.totalorder %s1197_s11, 0 }
  0x48   : > { %s681_s19 = sshll.u32 %s287_s17, 3  ;;  %778 = vmatprep.subr.bf16.mxu0 %v777_v5  ;;  %v793_v42 = vpack.c.bf16 %v355_v39, %v354_v38  ;;  %v357_v44 = vld [vmem:[#allocation4 + $0x68] sm:$0xff]  ;;  %v358_v46 = vld [vmem:[#allocation4 + $0x70] sm:$0xff]  ;;  %v359_v47 = vld [vmem:[#allocation4 + $0x78] sm:$0xff]  ;;  %s679_s9 = sshll.u32 %s278_s8, 5 }
  0x49   : > { %s303_s21 = scalar_lea.vmem %s1190_s2, %s681_s19  ;;  %v319_v8 = vstv %s684_s16  ;;  %s1110_s24 = scalar_lea.vmem %s1189_s1, %s681_s19  ;;  %v797_v45 = vpack.c.bf16 %v357_v44, %v356_v43  ;;  %v801_v48 = vpack.c.bf16 %v359_v47, %v358_v46  ;;  %v691_v57 = vld [vmem:[%s1193_s5] ss:$0 sm:$0xff] }
  0x4a   : > { %v314_v12 = vld [vmem:[%s303_s21] sm:$0xff]  ;;  %v325_v13 = vstv %s685_s18  ;;  %v315_v17 = vld [vmem:[%s303_s21 + $0x8] sm:$0xff]  ;;  %v316_v19 = vld [vmem:[%s303_s21 + $0x10] sm:$0xff]  ;;  %s280_s18 = scalar_lea.vmem [#allocation7], %s679_s9  ;;  %s1128_s19 = scalar_lea.sflag [#allocation6], %s278_s8 }
  0x4b   : > { %v320_v15 = vmul.f32 %v319_v8, %v314_v12  ;;  %v340_v16 = vld [vmem:[%s1110_s24] sm:$0xff]  ;;  %v321_v18 = vmul.f32 %v319_v8, %v315_v17  ;;  %v317_v20 = vld [vmem:[%s303_s21 + $0x18] sm:$0xff]  ;;  %780 = vmatpush3.bf16.msra.mxu0 %v777_v5  ;;  %v322_v22 = vmul.f32 %v319_v8, %v316_v19  ;;  %v335_v25 = vstv %s1102_s13  ;;  %v341_v49 = vld [vmem:[%s1110_s24 + $0x8] sm:$0xff]  ;;  %s576_s13 = ssub.s32 (%p1204_p11), 7, %s1098_s14 }
  0x4c   : > { %759 = vmatprep.mubr.f32.mxu0 %v340_v16  ;;  %v323_v23 = vmul.f32 %v319_v8, %v317_v20  ;;  %782 = vmatprep.subr.bf16.mxu0 %v781_v9  ;;  %v342_v50 = vld [vmem:[%s1110_s24 + $0x10] sm:$0xff]  ;;  %v343_v51 = vld [vmem:[%s1110_s24 + $0x18] sm:$0xff]  ;;  %p577_p0 = scmp.lt.s32.totalorder (%p1204_p11), %s576_s13, 4 }
  0x4d   : > { %v326_v21 = vadd.f32 %v325_v13, %v320_v15  ;;  %v327_v26 = vadd.f32 %v325_v13, %v321_v18  ;;  %v328_v30 = vadd.f32 %v325_v13, %v322_v22 }
  0x4e   : > { %v329_v31 = vadd.f32 %v325_v13, %v323_v23 }
  0x4f   : > { %v330_v29 = vmul.f32 %v326_v21, %v314_v12  ;;  %v331_v32 = vmul.f32 %v327_v26, %v315_v17  ;;  %784 = vmatpush3.bf16.msra.mxu0 %v781_v9  ;;  %v332_v34 = vmul.f32 %v328_v30, %v316_v19 }
  0x50   : > { %v333_v35 = vmul.f32 %v329_v31, %v317_v20  ;;  %786 = vmatprep.subr.bf16.mxu0 %v785_v24 }
  0x51   : > { %v336_v33 = vadd.f32 %v335_v25, %v330_v29  ;;  %v337_v37 = vadd.f32 %v335_v25, %v331_v32  ;;  %v338_v40 = vadd.f32 %v335_v25, %v332_v34 }
  0x52   : > { %v339_v41 = vadd.f32 %v335_v25, %v333_v35 }
  0x53   : > { %767 = vmatprep.mubr.msk.f32.mxu1 %vm446_vm1, %v336_v33  ;;  %788 = vmatpush3.bf16.msra.mxu0 %v785_v24 }
  0x54   : > { %768 = vmatmul.mubr.msk.f32.vlgmr.msra.gmra.mrb[0].mxu1 %vm446_vm1, %v337_v37  ;;  %790 = vmatprep.subr.bf16.mxu0 %v789_v36 }
  0x55   : > { %770 = vmatprep.mubr.msk.f32.mxu1 %vm446_vm1, %v338_v40 }
  0x57   : > { %792 = vmatpush3.bf16.msra.mxu0 %v789_v36 }
  0x58   : > { %771 = vmatmul.mubr.msk.f32.gmra.mrb[2].mxu1 %vm446_vm1, %v339_v41  ;;  %794 = vmatprep.subr.bf16.mxu0 %v793_v42 }
  0x5b   : > { %796 = vmatpush3.bf16.msra.mxu0 %v793_v42 }
  0x5c   : > { %798 = vmatprep.subr.bf16.mxu0 %v797_v45 }
  0x5f   : > { %800 = vmatpush3.bf16.msra.mxu0 %v797_v45 }
  0x60   : > { %802 = vmatprep.subr.bf16.mxu0 %v801_v48 }
  0x63   : > { %804 = vmatpush3.bf16.msra.mxu0 %v801_v48 }
  0x66   : > { %760 = vmatmul.mubr.f32.vlgmr.msra.gmra.mrb[0].mxu0 %v341_v49 }
  0x67   : > { %762 = vmatprep.mubr.f32.mxu0 %v342_v50 }
  0x6a   : > { %763 = vmatmul.mubr.f32.gmra.mrb[2].mxu0 %v343_v51 }
 0x127   : > { %v769_v52 = vpop.f32.mrb[0].mxu1 }
 0x128   : > { %v529_v53 = vpop.f32.mrb[1].mxu1 }
 0x12b   : > { %v772_v54 = vpop.f32.mrb[2].mxu1 }
 0x12c   : > { %v539_v55 = vpop.f32.mrb[3].mxu1 }
 0x139   : > { %v761_v56 = vpop.f32.mrb[0].mxu0 }
 0x13a   : > { %v549_v58 = vmul.f32 %v769_v52, %v761_v56  ;;  %v426_v59 = vpop.f32.mrb[1].mxu0 }
 0x13b   : > { %v548_v60 = vmul.f32 %v529_v53, %v426_v59 }
 0x13c   : > { %v560_v61 = vadd.f32 %v691_v57, %v549_v58 }
 0x13d   : > { %v559_v62 = vadd.f32 %v691_v57, %v548_v60  ;;  %v764_v63 = vpop.f32.mrb[2].mxu0  ;;  %574 = sbr.rel (!%p1204_p11) target bundleno = 352 (0x160), region = 48 }
 0x13e   : > { %564 = vst [vmem:[%s280_s18 + $0x8] sm:$0xff] %v560_v61  ;;  %v551_v0 = vmul.f32 %v772_v54, %v764_v63  ;;  %v436_v1 = vpop.f32.mrb[3].mxu0 }
 0x13f   : > { %563 = vst [vmem:[%s280_s18] sm:$0xff] %v559_v62  ;;  %v550_v2 = vmul.f32 %v539_v55, %v436_v1 }
 0x140   : > { %v562_v3 = vadd.f32 %v691_v57, %v551_v0 }
 0x141   : > { %v561_v4 = vadd.f32 %v691_v57, %v550_v2 }
 0x142   : > { %566 = vst [vmem:[%s280_s18 + $0x18] sm:$0xff] %v562_v3 }
 0x143   : > { %565 = vst [vmem:[%s280_s18 + $0x10] sm:$0xff] %v561_v4 }
 0x144   : > { %s1211_s13 = smov (!%p577_p0, %s576_s13), 4 }
 0x145   : > { %s1133_s15 = sshll.u32 %s1211_s13, 7 }
 0x146   : > { %s581_s20 = ssub.s32 512, %s1133_s15 }
 0x147   : > { %582 = vsyncadd %s1128_s19, %s581_s20  ;;  %p695_p1 = scmp.ne.s32.totalorder %s1133_s15, 0  ;;  %s701_s21 = sshll.u32 %s1035_s29, 9 }
 0x148   : > { %s1142_s11 = scalar_lea.hbm %s1194_s6, %s701_s21  ;;  %s587_s24 = sshll.u32 %s280_s18, 4  ;;  %s1144_s24 = int_to_ptr.vmem [resolvable:$true] %s587_s24 }
 0x149   : > { %s899_s14 = scalar_lea.vmem %s1144_s24, %s1133_s15  ;;  %s973_s25 = smov [#allocation7]  }
 0x14a   : > { %p900_p3 = scmp.ne.s32.totalorder %s1144_s24, %s899_s14  ;;  %s903_s30 = sshll.u32 %s973_s25, 4  ;;  %s904_s30 = int_to_ptr.vmem [resolvable:$false] %s903_s30 }
 0x14b   : > { %s905_s29 = scalar_lea.vmem %s904_s30, 1024  ;;  %p906_p9 = scmp.lt.s32.totalorder %s1144_s24, %s904_s30 }
 0x14c   : > { %p901_p7 = pnand %p900_p3, %p695_p1  ;;  %p907_p12 = scmp.lt.s32.totalorder %s905_s29, %s899_s14 }
 0x14e   : > { %p902_p8 = pneg %p901_p7  ;;  %p908_p13 = por %p907_p12, %p906_p9 }
 0x150   : > { %p909_p2 = pnand %p908_p13, %p902_p8 }
 0x152   : > { %912 = shalt.err (!%p909_p2)
}
 0x153   : > { %s913_s8 = scalar_lea.hbm %s1142_s11, %s1133_s15  ;;  %s917_s17 = scalar_lea.hbm %s1194_s6, 896 }
 0x154   : > { %p914_p4 = scmp.ne.s32.totalorder %s1142_s11, %s913_s8  ;;  %p918_p10 = scmp.lt.u32.totalorder %s1142_s11, %s1194_s6 }
 0x155   : > { %p919_p11 = scmp.lt.u32.totalorder %s917_s17, %s913_s8  ;;  %p921_p3 = scmp.lt.u32.totalorder %s913_s8, %s1142_s11 }
 0x156   : > { %p915_p6 = pnand %p914_p4, %p695_p1 }
 0x157   : > { %p920_p0 = por %p919_p11, %p918_p10 }
 0x158   : > { %p916_p5 = pneg %p915_p6 }
 0x159   : > { %p922_p7 = por %p921_p3, %p920_p0 }
 0x15b   : > { %p923_p8 = pnand %p922_p7, %p916_p5 }
 0x15d   : > { %926 = shalt.err (!%p923_p8)
}
 0x15e   : > { %s974_s20 = smov 128   ;;  %s975_s21 = smov 8  }
 0x15f   : > { %593 = dma.vmem_to_hbm [thread:$0]  (%p695_p1), %s1144_s24, %s1133_s15, %s1142_s11, %s1128_s19, %s974_s20, %s974_s20, %s975_s21  }
 0x160 PF: > { %p820_p9 = scmp.ge.s32.totalorder %s967_s28, 2  ;;  %s602_s22 = sand.u32 1, %s955_s26  }
 0x161   : > { %p1205_p12 = scmp.ne.s32.totalorder %s1198_s12, 0  ;;  %s603_s23 = scalar_lea.sflag [#allocation6], %s602_s22 }
 0x163   : > { %p815_p13 = pnand %p820_p9, %p1205_p12 }
 0x165   : > { %950 = dma.done.wait (!%p815_p13), %s603_s23, 512  }
 0x166   : > { %952 = vsyncadd (!%p815_p13), %s603_s23, 4294966784  ;;  %p23_p2 = scmp.ge.s32.totalorder %s1039_s7, 4   ;;  %s1206_s26 = smov %s959_s27 }
 0x167   : > { %s1207_s27 = smov %s963_s0  ;;  %s1208_s0 = smov %s1050_s10 }
 0x168   : > { %s1209_s28 = smov %s1039_s7  ;;  %25 = sbr.rel (!%p23_p2) target bundleno = 19 (0x13), region = 83 }
 0x16f   :  { %608 = vsyncpa [#allocation5], 1 }
 0x170   :  { %610 = vsyncpa [#allocation5 + $0x1], 1 }
 0x171   :  { %611 = vsyncpa [#allocation6], 1 }
 0x172   :  { %613 = vsyncpa [#allocation6 + $0x1], 1 }

</bundles_post_ra>
